<compile_context>
chip_gen: v7x
topology: tpu7x:2x2x1
jax: 0.10.0
libtpu: 0.0.40
codegen_flags: <defaults>
</compile_context>

<pallas_src>
import math

import jax
import jax.numpy as jnp
from jax.experimental import pallas as pl
from jax.experimental.pallas import tpu as pltpu


def _valuenet_kernel(obs_t_ref, w1_ref, w2_ref, aux_ref, b3_ref, out_ref):
    # obs_t_ref: (obs_dim, tb)  -- batch on lanes (lane-dense stream)
    # w1_ref:    (hidden, obs_dim)   torch layout (out_features, in_features)
    # w2_ref:    (hidden, hidden)
    # aux_ref:   (hidden, 3) = [b1 | b2 | w3-column], f32
    # b3_ref:    (1,) scalar in SMEM
    # out_ref:   (1, tb)
    xt = obs_t_ref[...]                                     # (obs_dim, tb)
    aux = aux_ref[...]                                      # (hidden, 3) f32
    b1c = aux[:, 0:1]                                       # (hidden, 1)
    b2c = aux[:, 1:2]
    w3c = aux[:, 2:3]

    # Layer 1 (MXU): (hidden, obs_dim) @ (obs_dim, tb) -> (hidden, tb)
    h1t = jnp.dot(w1_ref[...], xt, preferred_element_type=jnp.float32)
    h1t = jnp.maximum(h1t + b1c, 0.0)                       # bias bcast over lanes

    # Layer 2 (MXU): (hidden, hidden) @ (hidden, tb) -> (hidden, tb)
    h2t = jnp.dot(w2_ref[...], h1t, preferred_element_type=jnp.float32)
    h2t = jnp.maximum(h2t + b2c, 0.0)

    # Head (hidden -> 1): VPU multiply + XLU sublane reduce; lane-dense result.
    v = jnp.sum(h2t * w3c, axis=0, keepdims=True) + b3_ref[0]   # (1, tb)

    out_ref[...] = v.astype(out_ref.dtype)


def _round_up(x, m):
    return ((x + m - 1) // m) * m


def _select_tiling(B, batch_tile):
    """Pick (tb, B_pad, num_tiles): tb multiple of 128, >=2 (and preferably
    even) grid steps when the batch allows, so v7x's 2 TCs both get work."""
    tb = max(128, min(_round_up(batch_tile, 128), _round_up(B, 128)))
    B_pad = _round_up(B, tb)
    nt = B_pad // tb
    if nt < 2 and tb > 128:
        tb = max(128, _round_up((tb + 1) // 2, 128))
        B_pad = _round_up(B, tb)
        nt = B_pad // tb
    if nt >= 2 and nt % 2 == 1 and tb > 128:
        tb_try = max(128, _round_up((tb + 1) // 2, 128))
        nt_try = _round_up(B, tb_try) // tb_try
        if nt_try % 2 == 0:
            tb, B_pad, nt = tb_try, _round_up(B, tb_try), nt_try
    return tb, B_pad, nt


def value_net_forward(obs, params, *, batch_tile=4096):
    """obs: (B, obs_dim) -> (B,)  ==  ValueNet.forward(obs)."""
    w1, b1, w2, b2, w3, b3 = params       # torch layout: w1 (hidden, obs_dim), ...
    B, obs_dim = obs.shape
    hidden = w1.shape[0]
    out_dtype = obs.dtype

    tb, B_pad, num_tiles = _select_tiling(B, batch_tile)

    # Lane-dense obs stream: (obs_dim, B_pad) with batch on the lane axis.
    # (Wrapper-side transpose is layout plumbing; callers that already hold
    #  obs as (obs_dim, B) could skip it.)
    obs_t = obs.T
    if B_pad != B:
        obs_t = jnp.pad(obs_t, ((0, 0), (0, B_pad - B)))

    # Merge the per-hidden column vectors into one resident (hidden, 3) array:
    # [b1 | b2 | w3-column].  Head/bias math in f32.
    aux = jnp.stack(
        [b1.astype(jnp.float32).reshape(hidden),
         b2.astype(jnp.float32).reshape(hidden),
         w3.astype(jnp.float32).reshape(hidden)],
        axis=1)                                            # (hidden, 3)
    b3s = b3.reshape(1).astype(jnp.float32)                # scalar -> SMEM

    out = pl.pallas_call(
        _valuenet_kernel,
        out_shape=jax.ShapeDtypeStruct((1, B_pad), out_dtype),
        grid_spec=pltpu.PrefetchScalarGridSpec(
            num_scalar_prefetch=0,
            grid=(num_tiles,),
            in_specs=[
                pl.BlockSpec((obs_dim, tb), lambda i: (0, i)),        # obs (lane-dense)
                pl.BlockSpec((hidden, obs_dim), lambda i: (0, 0)),    # W1 (resident)
                pl.BlockSpec((hidden, hidden), lambda i: (0, 0)),     # W2 (resident)
                pl.BlockSpec((hidden, 3), lambda i: (0, 0)),          # [b1|b2|w3]
                pl.BlockSpec(memory_space=pltpu.MemorySpace.SMEM),    # b3 scalar
            ],
            out_specs=pl.BlockSpec((1, tb), lambda i: (0, i)),        # lane-dense
        ),
        compiler_params=pltpu.CompilerParams(
            dimension_semantics=("parallel",),
            vmem_limit_bytes=32 * 1024 * 1024,   # safe on v7x (64 MiB/TC) and v5e/v6e
        ),
    )(obs_t, w1, w2, aux, b3s)

    return out.reshape(B_pad)[:B]


def init_value_net_params(key, obs_dim, hidden_size, dtype=jnp.float32):
    """torch.nn.Linear-style init (uniform +-1/sqrt(fan_in)); weights kept in
    PyTorch (out_features, in_features) layout."""
    keys = jax.random.split(key, 6)

    def linear(kw, kb, fan_in, fan_out):
        bound = 1.0 / math.sqrt(fan_in)
        w = jax.random.uniform(kw, (fan_out, fan_in), jnp.float32,
                               minval=-bound, maxval=bound).astype(dtype)
        b = jax.random.uniform(kb, (fan_out,), jnp.float32,
                               minval=-bound, maxval=bound).astype(dtype)
        return w, b

    w1, b1 = linear(keys[0], keys[1], obs_dim, hidden_size)
    w2, b2 = linear(keys[2], keys[3], hidden_size, hidden_size)
    w3, b3 = linear(keys[4], keys[5], hidden_size, 1)
    return (w1, b1, w2, b2, w3, b3)


def _reference_forward(obs, params):
    w1, b1, w2, b2, w3, b3 = params
    h1 = jnp.maximum(obs @ w1.T + b1, 0.0)
    h2 = jnp.maximum(h1 @ w2.T + b2, 0.0)
    return (h2 @ w3.T + b3)[:, 0]


if __name__ == "__main__":
    key = jax.random.PRNGKey(0)
    k_params, k_obs, k_obs2 = jax.random.split(key, 3)

    batch, obs_dim, hidden_size = 16, 8, 32
    params = init_value_net_params(k_params, obs_dim, hidden_size)

    # Small-shape check (single tile, padded batch).
    obs = jax.random.normal(k_obs, (batch, obs_dim), dtype=jnp.float32)
    v = jax.block_until_ready(value_net_forward(obs, params))
    v_ref = _reference_forward(obs, params)
    assert v.shape == (batch,)
    assert jnp.allclose(v, v_ref, atol=1e-4, rtol=1e-4), (
        float(jnp.max(jnp.abs(v - v_ref))))

    # Multi-tile check (exercises the parallel batch grid + even tile count).
    big_batch = 1000
    obs2 = jax.random.normal(k_obs2, (big_batch, obs_dim), dtype=jnp.float32)
    v2 = jax.block_until_ready(value_net_forward(obs2, params))
    v2_ref = _reference_forward(obs2, params)
    assert v2.shape == (big_batch,)
    assert jnp.allclose(v2, v2_ref, atol=1e-4, rtol=1e-4), (
        float(jnp.max(jnp.abs(v2 - v2_ref))))

    print("KERNEL_OK")
</pallas_src>

<mosaic_0001>
module attributes {stable_mosaic.version = 11 : i64} {
  func.func @_valuenet_kernel(%arg0: i32, %arg1: memref<8x128xf32, #tpu.memory_space<vmem>>, %arg2: memref<32x8xf32, #tpu.memory_space<vmem>>, %arg3: memref<32x32xf32, #tpu.memory_space<vmem>>, %arg4: memref<32x3xf32, #tpu.memory_space<vmem>>, %arg5: memref<1xf32, #tpu.memory_space<smem>>, %arg6: memref<1x128xf32, #tpu.memory_space<vmem>>) attributes {dimension_semantics = [#tpu.dimension_semantics<parallel>], iteration_bounds = array<i64: 1>, scalar_prefetch = 0 : i64, scratch_operands = 0 : i64, tpu.core_type = #tpu.core_type<tc>, window_params = [{transform_indices = @transform_0, window_bounds = array<i64: 8, 128>}, {pipeline_mode = #tpu.pipeline_mode<synchronous>, transform_indices = @transform_1, window_bounds = array<i64: 32, 8>}, {pipeline_mode = #tpu.pipeline_mode<synchronous>, transform_indices = @transform_2, window_bounds = array<i64: 32, 32>}, {pipeline_mode = #tpu.pipeline_mode<synchronous>, transform_indices = @transform_3, window_bounds = array<i64: 32, 3>}, {transform_indices = @transform_4, window_bounds = array<i64: 1>}, {transform_indices = @transform_5, window_bounds = array<i64: 1, 128>}]} {
    %c0 = arith.constant 0 : index
    %c0_0 = arith.constant 0 : index
    %0 = vector.load %arg1[%c0, %c0_0] : memref<8x128xf32, #tpu.memory_space<vmem>>, vector<8x128xf32>
    %c0_1 = arith.constant 0 : index
    %c0_2 = arith.constant 0 : index
    %1 = vector.load %arg4[%c0_1, %c0_2] : memref<32x3xf32, #tpu.memory_space<vmem>>, vector<32x3xf32>
    %2 = vector.extract_strided_slice %1 {offsets = [0, 0], sizes = [32, 1], strides = [1, 1]} : vector<32x3xf32> to vector<32x1xf32>
    %3 = vector.extract_strided_slice %1 {offsets = [0, 1], sizes = [32, 1], strides = [1, 1]} : vector<32x3xf32> to vector<32x1xf32>
    %4 = vector.extract_strided_slice %1 {offsets = [0, 2], sizes = [32, 1], strides = [1, 1]} : vector<32x3xf32> to vector<32x1xf32>
    %c0_3 = arith.constant 0 : index
    %c0_4 = arith.constant 0 : index
    %5 = vector.load %arg2[%c0_3, %c0_4] : memref<32x8xf32, #tpu.memory_space<vmem>>, vector<32x8xf32>
    %cst = arith.constant dense<0.000000e+00> : vector<32x128xf32>
    %6 = tpu.matmul %5, %0, %cst {dimension_numbers = #tpu.dot_dimension_numbers<[1], [0], [0], [1], [0, 0, 1, 1], [], []>} : vector<32x8xf32>, vector<8x128xf32>, vector<32x128xf32> -> vector<32x128xf32>
    %7 = vector.broadcast %2 : vector<32x1xf32> to vector<32x128xf32>
    %8 = arith.addf %6, %7 : vector<32x128xf32>
    %cst_5 = arith.constant 0.000000e+00 : f32
    %9 = vector.broadcast %cst_5 : f32 to vector<32x128xf32>
    %10 = arith.maximumf %8, %9 : vector<32x128xf32>
    %c0_6 = arith.constant 0 : index
    %c0_7 = arith.constant 0 : index
    %11 = vector.load %arg3[%c0_6, %c0_7] : memref<32x32xf32, #tpu.memory_space<vmem>>, vector<32x32xf32>
    %cst_8 = arith.constant dense<0.000000e+00> : vector<32x128xf32>
    %12 = tpu.matmul %11, %10, %cst_8 {dimension_numbers = #tpu.dot_dimension_numbers<[1], [0], [0], [1], [0, 0, 1, 1], [], []>} : vector<32x32xf32>, vector<32x128xf32>, vector<32x128xf32> -> vector<32x128xf32>
    %13 = vector.broadcast %3 : vector<32x1xf32> to vector<32x128xf32>
    %14 = arith.addf %12, %13 : vector<32x128xf32>
    %cst_9 = arith.constant 0.000000e+00 : f32
    %15 = vector.broadcast %cst_9 : f32 to vector<32x128xf32>
    %16 = arith.maximumf %14, %15 : vector<32x128xf32>
    %17 = vector.broadcast %4 : vector<32x1xf32> to vector<32x128xf32>
    %18 = arith.mulf %16, %17 : vector<32x128xf32>
    %cst_10 = arith.constant dense<0.000000e+00> : vector<128xf32>
    %19 = vector.multi_reduction <add>, %18, %cst_10 [0] : vector<32x128xf32> to vector<128xf32>
    %20 = vector.shape_cast %19 : vector<128xf32> to vector<1x128xf32>
    %c0_11 = arith.constant 0 : index
    %21 = memref.load %arg5[%c0_11] : memref<1xf32, #tpu.memory_space<smem>>
    %22 = vector.broadcast %21 : f32 to vector<1x128xf32>
    %23 = arith.addf %20, %22 : vector<1x128xf32>
    %c0_12 = arith.constant 0 : index
    %c0_13 = arith.constant 0 : index
    %24 = vector.load %arg6[%c0_12, %c0_13] : memref<1x128xf32, #tpu.memory_space<vmem>>, vector<1x128xf32>
    tpu.vector_store %arg6[%c0_12, %c0_13], %23 {strides = array<i32>} : memref<1x128xf32, #tpu.memory_space<vmem>>, vector<1x128xf32>,
    return
  }
  func.func @transform_0(%arg0: i32) -> (i32, i32) {
    %c0_i32 = arith.constant 0 : i32
    %c0_i32_0 = arith.constant 0 : i32
    return %c0_i32, %arg0 : i32, i32
  }
  func.func @transform_1(%arg0: i32) -> (i32, i32) {
    %c0_i32 = arith.constant 0 : i32
    %c0_i32_0 = arith.constant 0 : i32
    %c0_i32_1 = arith.constant 0 : i32
    return %c0_i32, %c0_i32_0 : i32, i32
  }
  func.func @transform_2(%arg0: i32) -> (i32, i32) {
    %c0_i32 = arith.constant 0 : i32
    %c0_i32_0 = arith.constant 0 : i32
    %c0_i32_1 = arith.constant 0 : i32
    return %c0_i32, %c0_i32_0 : i32, i32
  }
  func.func @transform_3(%arg0: i32) -> (i32, i32) {
    %c0_i32 = arith.constant 0 : i32
    %c0_i32_0 = arith.constant 0 : i32
    %c0_i32_1 = arith.constant 0 : i32
    return %c0_i32, %c0_i32_0 : i32, i32
  }
  func.func @transform_4(%arg0: i32) -> i32 {
    %c0_i32 = arith.constant 0 : i32
    %c0_i32_0 = arith.constant 0 : i32
    return %c0_i32 : i32
  }
  func.func @transform_5(%arg0: i32) -> (i32, i32) {
    %c0_i32 = arith.constant 0 : i32
    %c0_i32_0 = arith.constant 0 : i32
    return %c0_i32, %arg0 : i32, i32
  }
}

</mosaic_0001>

<bundles_post_ra>
// kernel: tpu_custom_call.1
= control target key start
LH: loop header
LB: loop body
LE: loop exit
PB: predicated region body
PF: predicated region fallthrough
CT: control target
= control target key end

     0   :  { %vm51_vm0 = vcmask 64512   ;;  %v411_v5 = vmov 0   ;;  %s507_s0 = inlined_call_operand.vmem [shape: f32[8,128], index: 0, kind: input, shape index: {}]   ;;  %s508_s1 = inlined_call_operand.vmem [shape: f32[32,8], index: 1, kind: input, shape index: {}]   ;;  %s509_s2 = inlined_call_operand.vmem [shape: f32[32,32], index: 2, kind: input, shape index: {}]   ;;  %s510_s3 = inlined_call_operand.vmem [shape: f32[32,3], index: 3, kind: input, shape index: {}]   ;;  %s511_s4 = inlined_call_operand.<no memory space> [shape: f32[1], index: 4, kind: input, shape index: {}]   ;;  %s512_s5 = inlined_call_operand.hbm [shape: f32[1,128], index: 5, kind: output, shape index: {}]  }
   0x1   :  { %v22_v0 = vld [vmem:[%s507_s0] sm:$0xff]  ;;  %v28_v2 = vld [vmem:[%s508_s1 + $0x8] sm:$0xff]  ;;  %v29_v3 = vld [vmem:[%s508_s1 + $0x10] sm:$0xff]  ;;  %381 = vset.pattern.permute.xlu0 %v411_v5 }
   0x2   :  { %v27_v1 = vld [vmem:[%s508_s1] sm:$0xff]  ;;  %343 = vmatprep.subr.mxu0 %v22_v0  ;;  %v25_v6 = vld [vmem:[%s510_s3 + $0x10] sm:$0xff] }
   0x3   :  { %345 = vmatprep.mubr.msk.f32.mxu0 %vm51_vm0, %v27_v1  ;;  %v23_v4 = vld [vmem:[%s510_s3] sm:$0xff]  ;;  %344 = vmatpush3.msra.mxu0 %v22_v0 }
   0x4   :  { %346 = vmatmul.mubr.msk.f32.vlgmr.msra.gmra.mrb[0].mxu0 %vm51_vm0, %v28_v2  ;;  %33 = vperm.xlu0 %381, %v23_v4  }
   0x5   :  { %11 = vsyncpa [#allocation4], 0  ;;  %348 = vmatprep.mubr.msk.f32.mxu0 %vm51_vm0, %v29_v3  ;;  %v30_v7 = vld [vmem:[%s508_s1 + $0x18] sm:$0xff]  ;;  %382 = vset.pattern.permute.xlu1 %v411_v5  ;;  %v24_v8 = vld [vmem:[%s510_s3 + $0x8] sm:$0xff]  ;;  %vm173_vm1 = vcmask 261120   ;;  %v412_v12 = vmov 1   ;;  %v305_v2 = vstv %s511_s4 }
   0x6   :  { %43 = vperm.xlu1 %382, %v25_v6   ;;  %v26_v9 = vld [vmem:[%s510_s3 + $0x18] sm:$0xff]  ;;  %v153_v10 = vld [vmem:[%s509_s2] sm:$0xff]  ;;  %v155_v11 = vld [vmem:[%s509_s2 + $0x10] sm:$0xff]  ;;  %v413_v13 = vmov 2   ;;  %s414_s17 = smov [#allocation3]  }
   0x7   :  { %362 = vmatprep.mubr.msk.f32.mxu1 %vm173_vm1, %v155_v11  ;;  %v154_v32 = vld [vmem:[%s509_s2 + $0x8] sm:$0xff]  ;;  %v156_v33 = vld [vmem:[%s509_s2 + $0x18] sm:$0xff]  ;;  %s314_s18 = sshll.u32 %s414_s17, 4  ;;  %s315_s18 = int_to_ptr.vmem [resolvable:$true] %s314_s18 }
   0x8   :  { %349 = vmatmul.mubr.msk.f32.gmra.mrb[2].mxu0 %vm51_vm0, %v30_v7  ;;  %38 = vperm.xlu0 %381, %v24_v8   ;;  %s387_s19 = scalar_lea.vmem %s315_s18, 16  ;;  %s391_s20 = scalar_lea.vmem %s315_s18, 32 }
   0x9   :  { %359 = vmatprep.mubr.msk.f32.mxu0 %vm173_vm1, %v153_v10  ;;  %p388_p0 = scmp.ne.s32.totalorder %s315_s18, %s387_s19  ;;  %p392_p1 = scmp.lt.s32.totalorder %s315_s18, %s315_s18 }
   0xa   :  { %48 = vperm.xlu1 %382, %v26_v9   ;;  %p393_p2 = scmp.lt.s32.totalorder %s391_s20, %s387_s19 }
   0xc   :  { %383 = vset.pattern.permute.xlu0 %v412_v12  ;;  %p394_p3 = por %p393_p2, %p392_p1 }
   0xd   :  { %158 = vperm.xlu0 %383, %v23_v4  }
   0xe   :  { %384 = vset.pattern.permute.xlu1 %v412_v12  ;;  %p395_p4 = pnand %p394_p3, %p388_p0 }
   0xf   :  { %162 = vperm.xlu1 %384, %v24_v8  }
  0x11   :  { %170 = vperm.xlu0 %383, %v26_v9  }
  0x13   :  { %166 = vperm.xlu1 %384, %v25_v6  }
  0x15   :  { %386 = vset.pattern.permute.xlu0 %v413_v13 }
  0x16   :  { %280 = vperm.xlu0 %386, %v24_v8  }
  0x17   :  { %385 = vset.pattern.permute.xlu1 %v413_v13 }
  0x18   :  { %276 = vperm.xlu1 %385, %v23_v4  }
  0x1c   :  { %284 = vperm.xlu1 %385, %v25_v6  }
  0x20   :  { %288 = vperm.xlu1 %385, %v26_v9  }
  0x83   :  { %v34_v14 = vpop.permute.xlu0 %33 }
  0x85   :  { %v44_v15 = vpop.permute.xlu1 %43 }
  0x87   :  { %v39_v16 = vpop.permute.xlu0 %38 }
  0x89   :  { %v49_v22 = vpop.permute.xlu1 %48 }
  0x8c   :  { %v159_v36 = vpop.permute.xlu0 %158 }
  0x8e   :  { %v163_v34 = vpop.permute.xlu1 %162 }
  0x90   :  { %v171_v38 = vpop.permute.xlu0 %170 }
  0x92   :  { %v167_v35 = vpop.permute.xlu1 %166 }
  0x95   :  { %v281_v47 = vpop.permute.xlu0 %280 }
  0x97   :  { %v277_v37 = vpop.permute.xlu1 %276 }
  0x9b   :  { %v285_v48 = vpop.permute.xlu1 %284 }
  0x9f   :  { %v289_v57 = vpop.permute.xlu1 %288 }
  0xd7   :  { %v347_v17 = vpop.f32.mrb[0].mxu0 }
  0xd8   :  { %v136_v18 = vadd.f32 %v347_v17, %v39_v16  ;;  %v130_v19 = vpop.f32.mrb[1].mxu0 }
  0xd9   :  { %v131_v20 = vadd.f32 %v130_v19, %v34_v14 }
  0xda   :  { %v150_v21 = vmax.f32 %v136_v18, 0.0 }
  0xdb   :  { %v149_v23 = vmax.f32 %v131_v20, 0.0  ;;  %v350_v24 = vpop.f32.mrb[2].mxu0 }
  0xdc   :  { %v146_v25 = vadd.f32 %v350_v24, %v49_v22  ;;  %v140_v26 = vpop.f32.mrb[3].mxu0 }
  0xdd   :  { %v365_v27 = vpack.c.bf16 %v150_v21, %v149_v23  ;;  %v141_v28 = vadd.f32 %v140_v26, %v44_v15 }
  0xde   :  { %v152_v29 = vmax.f32 %v146_v25, 0.0 }
  0xdf   :  { %v151_v30 = vmax.f32 %v141_v28, 0.0  ;;  %366 = vmatprep.subr.bf16.mxu0 %v365_v27  ;;  %373 = vmatprep.subr.bf16.mxu1 %v365_v27 }
  0xe0   :  { %368 = vmatpush3.bf16.msra.mxu0 %v365_v27  ;;  %375 = vmatpush3.bf16.msra.mxu1 %v365_v27 }
  0xe1   :  { %v369_v31 = vpack.c.bf16 %v152_v29, %v151_v30 }
  0xe3   :  { %370 = vmatprep.subr.bf16.mxu0 %v369_v31  ;;  %374 = vmatprep.subr.bf16.mxu1 %v369_v31 }
  0xe4   :  { %372 = vmatpush3.bf16.msra.mxu0 %v369_v31  ;;  %376 = vmatpush3.bf16.msra.mxu1 %v369_v31 }
  0xe7   :  { %360 = vmatmul.mubr.msk.f32.vlgmr.msra.gmra.mrb[4].mxu0 %vm173_vm1, %v154_v32  ;;  %363 = vmatmul.mubr.msk.f32.vlgmr.msra.gmra.mrb[0].mxu1 %vm173_vm1, %v156_v33 }
 0x1ba   :  { %v361_v39 = vpop.f32.mrb[4].mxu0  ;;  %v364_v40 = vpop.f32.mrb[0].mxu1 }
 0x1bb   :  { %v258_v41 = vadd.f32 %v361_v39, %v163_v34  ;;  %v252_v42 = vpop.f32.mrb[5].mxu0  ;;  %v262_v43 = vpop.f32.mrb[1].mxu1  ;;  %v268_v44 = vadd.f32 %v364_v40, %v171_v38 }
 0x1bc   :  { %v253_v45 = vadd.f32 %v252_v42, %v159_v36  ;;  %v263_v46 = vadd.f32 %v262_v43, %v167_v35 }
 0x1bd   :  { %v272_v49 = vmax.f32 %v258_v41, 0.0  ;;  %v274_v53 = vmax.f32 %v268_v44, 0.0 }
 0x1be   :  { %v271_v50 = vmax.f32 %v253_v45, 0.0  ;;  %v273_v51 = vmax.f32 %v263_v46, 0.0 }
 0x1bf   :  { %v292_v52 = vmul.f32 %v281_v47, %v272_v49  ;;  %v294_v58 = vmul.f32 %v289_v57, %v274_v53 }
 0x1c0   :  { %v291_v54 = vmul.f32 %v277_v37, %v271_v50  ;;  %v293_v55 = vmul.f32 %v285_v48, %v273_v51 }
 0x1c2   :  { %v295_v56 = vadd.f32 %v292_v52, %v291_v54 }
 0x1c4   :  { %v296_v59 = vadd.f32 %v295_v56, %v293_v55 }
 0x1c6   :  { %v297_v60 = vadd.f32 %v296_v59, %v294_v58 }
 0x1c8   :  { %v298_v61 = vrot.slane %v297_v60, 4 }
 0x1ca   :  { %v299_v62 = vadd.f32 %v298_v61, %v297_v60 }
 0x1cc   :  { %v300_v63 = vrot.slane %v299_v62, 2 }
 0x1ce   :  { %v301_v0 = vadd.f32 %v300_v63, %v299_v62 }
 0x1d0   :  { %v302_v1 = vrot.slane %v301_v0, 1 }
 0x1d2   :  { %v303_v3 = vadd.f32 %v302_v1, %v301_v0 }
 0x1d4   :  { %v306_v4 = vadd.f32 %v305_v2, %v303_v3 }
 0x1d6   :  { %307 = vst [vmem:[#allocation3] sm:$0x1] %v306_v4 }
 0x1d7   :  { %398 = shalt.err (!%p395_p4)
}
 0x1d8   :  { %s399_s23 = scalar_lea.hbm %s512_s5, 16 }
 0x1d9   :  { %p400_p5 = scmp.ne.s32.totalorder %s512_s5, %s399_s23  ;;  %p403_p6 = scmp.lt.u32.totalorder %s399_s23, %s512_s5 }
 0x1db   :  { %p405_p7 = pnand %p403_p6, %p400_p5 }
 0x1dd   :  { %408 = shalt.err (!%p405_p7)
}
 0x1de   :  { %317 = dma.vmem_to_hbm [thread:$0]  %s315_s18, 16, %s512_s5, [#allocation4]  }
 0x1df   :  { %409 = dma.done.wait [#allocation4], 16  }
 0x1e0   :  { %410 = vsyncadd [#allocation4], 4294967280 }
 0x1e1   :  { %321 = vsyncpa [#allocation4], 1 }

</bundles_post_ra>
